<compile_context>
chip_gen: v7x
topology: tpu7x:2x2x1
jax: 0.10.0
libtpu: 0.0.40
codegen_flags: <defaults>
</compile_context>

<pallas_src>
import jax
import jax.numpy as jnp
from jax.experimental import pallas as pl
from jax.experimental.pallas import tpu as pltpu

HIDDEN = 32      # hidden_size (small synthetic size)
VOCAB = 64       # output_size
MAX_LEN = 8      # max_length (attention span / encoder seq length)
LANES = 128      # TPU lane width; slab, enc pad and packed output use this
NEG = -1e30      # pre-baked into padded softmax-bias lanes -> exp() == 0

APPROX_SOFTMAX_RECIPROCAL = True   # False for exact-division parity tests

# ---- packed weight-slab row layout (weight-section starts are 8-aligned) ----
R_WA_E = 0 * HIDDEN          # (H, L)   attn, embedded half
R_WA_H = 1 * HIDDEN          # (H, L)   attn, hidden half
R_WC_E = 2 * HIDDEN          # (H, H)   attn_combine, embedded half
R_WC_A = 3 * HIDDEN          # (H, H)   attn_combine, attn_applied half
R_WI = 4 * HIDDEN            # (H, 3H)  GRU in->hid  [wir | wiz | win]
R_WH = 5 * HIDDEN            # (H, 3H)  GRU hid->hid [whr | whz | whn]
R_WO = 6 * HIDDEN            # (H, V)   out
R_BIAS = 7 * HIDDEN          # bias rows (one bias vector per row)
B_ATTN = R_BIAS + 0          # (1, 128) ba, lanes >= L hold -1e30
B_COMB = R_BIAS + 1          # (1, H)   bc
B_GI = R_BIAS + 2            # (1, 3H)  [bir+bhr | biz+bhz | bin]
B_HN = R_BIAS + 3            # (1, H)   bhn
B_OUT = R_BIAS + 4           # (1, 128) bo, lanes >= V hold -1e30
SLAB_ROWS = R_BIAS + 8       # 232 rows x 128 lanes x f32 ~= 119 KiB

# packed output column layout: [ logp (V) | h_new (H) | attn_w (L) | zero pad ]
O_LOGP = 0
O_HID = VOCAB
O_ATTN = VOCAB + HIDDEN
O_USED = VOCAB + HIDDEN + MAX_LEN   # 104 of 128 lanes used


def attn_decoder_kernel(tok_ref, h0_ref, enc_ref, emb_ref, w_ref, out_ref, h_ref):
    t = pl.program_id(0)

    # ---- carry hidden state across grid steps in VMEM scratch ----
    @pl.when(t == 0)
    def _():
        h_ref[...] = h0_ref[...]

    tok = tok_ref[t]                       # SMEM-prefetched token id
    emb = emb_ref[tok]                     # (1, H) in-kernel embedding lookup
    hid = h_ref[...]                       # (1, H) previous hidden state
    # dropout(p=0.1) == identity (eval mode)

    # ---- attn(cat(embedded, hidden)) -> softmax, full 128 lanes (no concat) ----
    wa_e = w_ref[R_WA_E:R_WA_E + HIDDEN, :]            # (H, 128), pad lanes zero
    wa_h = w_ref[R_WA_H:R_WA_H + HIDDEN, :]            # (H, 128)
    ba = w_ref[B_ATTN:B_ATTN + 1, :]                   # (1, 128), pad lanes -1e30
    attn_logits = (jnp.dot(emb, wa_e, preferred_element_type=jnp.float32)
                   + jnp.dot(hid, wa_h, preferred_element_type=jnp.float32)
                   + ba)                               # (1, 128)
    m = jnp.max(attn_logits, axis=1, keepdims=True)
    e = jnp.exp(attn_logits - m)                       # pad lanes -> exactly 0
    denom = jnp.sum(e, axis=1, keepdims=True)
    if APPROX_SOFTMAX_RECIPROCAL:
        attn_w = e * pl.reciprocal(denom, approx=True)  # EUP slot, ~free
    else:
        attn_w = e / denom                             # (1, 128)

    # ---- bmm(attn_weights, encoder_outputs); enc zero-padded to 128 rows ----
    attn_applied = jnp.dot(attn_w, enc_ref[...],
                           preferred_element_type=jnp.float32)   # (1, H)

    # ---- attn_combine(cat(embedded, attn_applied)) + ReLU (split, no concat) ----
    wc_e = w_ref[R_WC_E:R_WC_E + HIDDEN, :HIDDEN]
    wc_a = w_ref[R_WC_A:R_WC_A + HIDDEN, :HIDDEN]
    bc = w_ref[B_COMB:B_COMB + 1, :HIDDEN]
    x = jnp.maximum(
        jnp.dot(emb, wc_e, preferred_element_type=jnp.float32)
        + jnp.dot(attn_applied, wc_a, preferred_element_type=jnp.float32)
        + bc, 0.0)                                     # (1, H)

    # ---- single-step GRU (PyTorch gate order r, z, n); 2 fused matmuls ----
    wi3 = w_ref[R_WI:R_WI + HIDDEN, :3 * HIDDEN]       # (H, 3H)
    wh3 = w_ref[R_WH:R_WH + HIDDEN, :3 * HIDDEN]       # (H, 3H)
    b_gi = w_ref[B_GI:B_GI + 1, :3 * HIDDEN]           # [bir+bhr | biz+bhz | bin]
    bhn = w_ref[B_HN:B_HN + 1, :HIDDEN]

    gi = jnp.dot(x, wi3, preferred_element_type=jnp.float32) + b_gi   # (1, 3H)
    gh = jnp.dot(hid, wh3, preferred_element_type=jnp.float32)        # (1, 3H)

    r = jax.nn.sigmoid(gi[:, 0:HIDDEN] + gh[:, 0:HIDDEN])
    z = jax.nn.sigmoid(gi[:, HIDDEN:2 * HIDDEN] + gh[:, HIDDEN:2 * HIDDEN])
    n = jnp.tanh(gi[:, 2 * HIDDEN:3 * HIDDEN]
                 + r * (gh[:, 2 * HIDDEN:3 * HIDDEN] + bhn))
    h_new = (1.0 - z) * n + z * hid                    # (1, H)
    h_ref[...] = h_new                                 # carry to next step

    # ---- out(h_new) + log_softmax over full 128 lanes (pad biases -1e30) ----
    wo = w_ref[R_WO:R_WO + HIDDEN, :]                  # (H, 128), pad lanes zero
    bo = w_ref[B_OUT:B_OUT + 1, :]                     # (1, 128), pad lanes -1e30
    logits = jnp.dot(h_new, wo, preferred_element_type=jnp.float32) + bo
    mo = jnp.max(logits, axis=1, keepdims=True)
    lse = jnp.log(jnp.sum(jnp.exp(logits - mo), axis=1, keepdims=True)) + mo
    logp = logits - lse                                # (1, 128); host slices :V

    # ---- pack this step's results into one lane-dense (1, 128) row ----
    pad = jnp.zeros((1, LANES - O_USED), dtype=jnp.float32)
    row = jnp.concatenate(
        [logp[:, :VOCAB], h_new, attn_w[:, :MAX_LEN], pad], axis=1)
    out_ref[...] = row.reshape(1, 1, LANES)


def pack_params(p):
    """Pack all weights/biases into one (SLAB_ROWS, 128) f32 slab (done once)."""
    wi3 = jnp.concatenate([p["wir"], p["wiz"], p["win"]], axis=1)      # (H, 3H)
    wh3 = jnp.concatenate([p["whr"], p["whz"], p["whn"]], axis=1)      # (H, 3H)
    b_gi = jnp.concatenate([p["bir"] + p["bhr"],
                            p["biz"] + p["bhz"],
                            p["bin"]], axis=1)                         # (1, 3H)

    slab = jnp.zeros((SLAB_ROWS, LANES), jnp.float32)
    slab = slab.at[R_WA_E:R_WA_E + HIDDEN, :MAX_LEN].set(p["wa_e"])
    slab = slab.at[R_WA_H:R_WA_H + HIDDEN, :MAX_LEN].set(p["wa_h"])
    slab = slab.at[R_WC_E:R_WC_E + HIDDEN, :HIDDEN].set(p["wc_e"])
    slab = slab.at[R_WC_A:R_WC_A + HIDDEN, :HIDDEN].set(p["wc_a"])
    slab = slab.at[R_WI:R_WI + HIDDEN, :3 * HIDDEN].set(wi3)
    slab = slab.at[R_WH:R_WH + HIDDEN, :3 * HIDDEN].set(wh3)
    slab = slab.at[R_WO:R_WO + HIDDEN, :VOCAB].set(p["wo"])
    # Softmax bias rows carry -1e30 in the padded lanes so the kernel can run
    # unmasked full-128-lane dots and reductions.
    slab = slab.at[B_ATTN].set(
        jnp.full((LANES,), NEG, jnp.float32).at[:MAX_LEN].set(p["ba"][0]))
    slab = slab.at[B_COMB, :HIDDEN].set(p["bc"][0])
    slab = slab.at[B_GI, :3 * HIDDEN].set(b_gi[0])
    slab = slab.at[B_HN, :HIDDEN].set(p["bhn"][0])
    slab = slab.at[B_OUT].set(
        jnp.full((LANES,), NEG, jnp.float32).at[:VOCAB].set(p["bo"][0]))
    return slab


@jax.jit
def attn_decoder_decode(token_ids, hidden0, encoder_outputs, emb_table, w_slab):
    """Run T teacher-forced decoder steps (T=1 == the module's forward).

    token_ids: int32 (T,); hidden0: (1,1,H); encoder_outputs: (L,H).
    Returns per-step (log_probs (T,V), hiddens (T,H), attn_weights (T,L)).
    """
    T = token_ids.shape[0]
    h0 = hidden0.reshape(1, HIDDEN).astype(jnp.float32)
    enc_pad = jnp.zeros((LANES, HIDDEN), jnp.float32).at[:MAX_LEN, :].set(
        encoder_outputs.astype(jnp.float32))
    emb3 = emb_table.reshape(VOCAB, 1, HIDDEN).astype(jnp.float32)

    grid_spec = pltpu.PrefetchScalarGridSpec(
        num_scalar_prefetch=1,                 # token ids -> SMEM
        grid=(T,),
        in_specs=[
            # constant block index -> stays VMEM-resident across all T steps
            pl.BlockSpec((1, HIDDEN), lambda t, toks: (0, 0)),           # h0
            pl.BlockSpec((LANES, HIDDEN), lambda t, toks: (0, 0)),       # enc
            pl.BlockSpec((VOCAB, 1, HIDDEN), lambda t, toks: (0, 0, 0)),  # emb
            pl.BlockSpec((SLAB_ROWS, LANES), lambda t, toks: (0, 0)),    # slab
        ],
        out_specs=pl.BlockSpec((1, 1, LANES), lambda t, toks: (t, 0, 0)),
        scratch_shapes=[pltpu.VMEM((1, HIDDEN), jnp.float32)],  # hidden carry
    )
    packed = pl.pallas_call(
        attn_decoder_kernel,
        out_shape=jax.ShapeDtypeStruct((T, 1, LANES), jnp.float32),
        grid_spec=grid_spec,
        compiler_params=pltpu.CompilerParams(
            dimension_semantics=("arbitrary",)),   # sequential: hidden carry
    )(token_ids.astype(jnp.int32), h0, enc_pad, emb3, w_slab)

    packed = packed.reshape(T, LANES)
    logp = packed[:, O_LOGP:O_LOGP + VOCAB]
    hiddens = packed[:, O_HID:O_HID + HIDDEN]
    attn_ws = packed[:, O_ATTN:O_ATTN + MAX_LEN]
    return logp, hiddens, attn_ws


def reference_decode(token_ids, hidden0, encoder_outputs, p):
    """Pure-JAX reference: T applications of the PyTorch forward (eval mode)."""
    wa = jnp.concatenate([p["wa_e"], p["wa_h"]], axis=0)
    wc = jnp.concatenate([p["wc_e"], p["wc_a"]], axis=0)

    def step(h, tok):
        emb = p["embedding"][tok].reshape(1, HIDDEN)
        eh = jnp.concatenate([emb, h], axis=1)
        attn_w = jax.nn.softmax(eh @ wa + p["ba"], axis=1)
        attn_applied = attn_w @ encoder_outputs
        x = jax.nn.relu(jnp.concatenate([emb, attn_applied], axis=1) @ wc + p["bc"])
        r = jax.nn.sigmoid(x @ p["wir"] + p["bir"] + h @ p["whr"] + p["bhr"])
        z = jax.nn.sigmoid(x @ p["wiz"] + p["biz"] + h @ p["whz"] + p["bhz"])
        n = jnp.tanh(x @ p["win"] + p["bin"] + r * (h @ p["whn"] + p["bhn"]))
        h_new = (1.0 - z) * n + z * h
        logp = jax.nn.log_softmax(h_new @ p["wo"] + p["bo"], axis=1)
        return h_new, (logp[0], h_new[0], attn_w[0])

    _, outs = jax.lax.scan(step, hidden0.reshape(1, HIDDEN), token_ids)
    return outs


def init_params(key):
    keys = jax.random.split(key, 24)

    def init(k, shape, scale=0.1):
        return (scale * jax.random.normal(k, shape)).astype(jnp.float32)

    return {
        "embedding": init(keys[0], (VOCAB, HIDDEN)),          # emb_vec
        # attn: Linear(2H -> L), pre-transposed and split (emb half, hid half)
        "wa_e": init(keys[1], (HIDDEN, MAX_LEN)),
        "wa_h": init(keys[2], (HIDDEN, MAX_LEN)),
        "ba": init(keys[3], (1, MAX_LEN)),
        # attn_combine: Linear(2H -> H), split the same way
        "wc_e": init(keys[4], (HIDDEN, HIDDEN)),
        "wc_a": init(keys[5], (HIDDEN, HIDDEN)),
        "bc": init(keys[6], (1, HIDDEN)),
        # GRU input->hidden (r, z, n) and hidden->hidden (r, z, n)
        "wir": init(keys[7], (HIDDEN, HIDDEN)),
        "wiz": init(keys[8], (HIDDEN, HIDDEN)),
        "win": init(keys[9], (HIDDEN, HIDDEN)),
        "bir": init(keys[10], (1, HIDDEN)),
        "biz": init(keys[11], (1, HIDDEN)),
        "bin": init(keys[12], (1, HIDDEN)),
        "whr": init(keys[13], (HIDDEN, HIDDEN)),
        "whz": init(keys[14], (HIDDEN, HIDDEN)),
        "whn": init(keys[15], (HIDDEN, HIDDEN)),
        "bhr": init(keys[16], (1, HIDDEN)),
        "bhz": init(keys[17], (1, HIDDEN)),
        "bhn": init(keys[18], (1, HIDDEN)),
        # out: Linear(H -> V)
        "wo": init(keys[19], (HIDDEN, VOCAB)),
        "bo": init(keys[20], (1, VOCAB)),
        "_enc_key": keys[21],
        "_tok_key": keys[22],
    }


if __name__ == "__main__":
    key = jax.random.PRNGKey(0)
    params = init_params(key)
    w_slab = pack_params(params)                                  # packed once

    T = 8                                                         # decode steps
    token_ids = jax.random.randint(params["_tok_key"], (T,), 0, VOCAB,
                                   dtype=jnp.int32)               # teacher-forced
    hidden0 = jnp.zeros((1, 1, HIDDEN), dtype=jnp.float32)        # initHidden()
    encoder_outputs = (0.1 * jax.random.normal(
        params["_enc_key"], (MAX_LEN, HIDDEN))).astype(jnp.float32)

    logp, hiddens, attn_ws = attn_decoder_decode(
        token_ids, hidden0, encoder_outputs, params["embedding"], w_slab)
    jax.block_until_ready((logp, hiddens, attn_ws))

    assert logp.shape == (T, VOCAB)
    assert hiddens.shape == (T, HIDDEN)
    assert attn_ws.shape == (T, MAX_LEN)

    # Check against a pure-JAX reference (loose tol covers the approx vrcp).
    ref_logp, ref_h, ref_attn = reference_decode(
        token_ids, hidden0, encoder_outputs, params)
    assert float(jnp.max(jnp.abs(logp - ref_logp))) < 1e-2
    assert float(jnp.max(jnp.abs(hiddens - ref_h))) < 1e-2
    assert float(jnp.max(jnp.abs(attn_ws - ref_attn))) < 1e-2

    # Final hidden, shaped like the module's `hidden` output.
    new_hidden = hiddens[-1].reshape(1, 1, HIDDEN)
    assert new_hidden.shape == (1, 1, HIDDEN)

    print("KERNEL_OK")
</pallas_src>

<mosaic_0001>
module attributes {stable_mosaic.version = 11 : i64} {
  func.func @attn_decoder_kernel(%arg0: i32, %arg1: memref<8xi32, #tpu.memory_space<smem>>, %arg2: memref<1x32xf32, #tpu.memory_space<vmem>>, %arg3: memref<128x32xf32, #tpu.memory_space<vmem>>, %arg4: memref<64x1x32xf32, #tpu.memory_space<vmem>>, %arg5: memref<232x128xf32, #tpu.memory_space<vmem>>, %arg6: memref<1x1x128xf32, #tpu.memory_space<vmem>>, %arg7: memref<1x32xf32, #tpu.memory_space<vmem>>) attributes {dimension_semantics = [#tpu.dimension_semantics<arbitrary>], iteration_bounds = array<i64: 8>, scalar_prefetch = 1 : i64, scratch_operands = 1 : i64, tpu.core_type = #tpu.core_type<tc>, window_params = [{pipeline_mode = #tpu.pipeline_mode<synchronous>, transform_indices = @transform_0, window_bounds = array<i64: 1, 32>}, {pipeline_mode = #tpu.pipeline_mode<synchronous>, transform_indices = @transform_1, window_bounds = array<i64: 128, 32>}, {pipeline_mode = #tpu.pipeline_mode<synchronous>, transform_indices = @transform_2, window_bounds = array<i64: 64, 1, 32>}, {pipeline_mode = #tpu.pipeline_mode<synchronous>, transform_indices = @transform_3, window_bounds = array<i64: 232, 128>}, {transform_indices = @transform_4, window_bounds = array<i64: 1, 1, 128>}]} {
    %c0_i32 = arith.constant 0 : i32
    %0 = arith.cmpi eq, %arg0, %c0_i32 : i32
    %1 = arith.extui %0 : i1 to i32
    %c0_i32_0 = arith.constant 0 : i32
    %2 = arith.cmpi ne, %1, %c0_i32_0 : i32
    scf.if %2 {
      %c0_40 = arith.constant 0 : index
      %c0_41 = arith.constant 0 : index
      %93 = vector.load %arg2[%c0_40, %c0_41] : memref<1x32xf32, #tpu.memory_space<vmem>>, vector<1x32xf32>
      %c0_42 = arith.constant 0 : index
      %c0_43 = arith.constant 0 : index
      %94 = vector.load %arg7[%c0_42, %c0_43] : memref<1x32xf32, #tpu.memory_space<vmem>>, vector<1x32xf32>
      tpu.vector_store %arg7[%c0_42, %c0_43], %93 {strides = array<i32>} : memref<1x32xf32, #tpu.memory_space<vmem>>, vector<1x32xf32>,
    } else {
    }
    %3 = arith.index_cast %arg0 : i32 to index
    %4 = memref.load %arg1[%3] : memref<8xi32, #tpu.memory_space<smem>>
    %5 = arith.index_cast %4 : i32 to index
    %c0 = arith.constant 0 : index
    %c0_1 = arith.constant 0 : index
    %6 = vector.load %arg4[%5, %c0, %c0_1] : memref<64x1x32xf32, #tpu.memory_space<vmem>>, vector<1x1x32xf32>
    %7 = vector.shape_cast %6 : vector<1x1x32xf32> to vector<1x32xf32>
    %c0_2 = arith.constant 0 : index
    %c0_3 = arith.constant 0 : index
    %8 = vector.load %arg7[%c0_2, %c0_3] : memref<1x32xf32, #tpu.memory_space<vmem>>, vector<1x32xf32>
    %c0_4 = arith.constant 0 : index
    %c0_5 = arith.constant 0 : index
    %9 = vector.load %arg5[%c0_4, %c0_5] : memref<232x128xf32, #tpu.memory_space<vmem>>, vector<32x128xf32>
    %c32 = arith.constant 32 : index
    %c0_6 = arith.constant 0 : index
    %10 = vector.load %arg5[%c32, %c0_6] : memref<232x128xf32, #tpu.memory_space<vmem>>, vector<32x128xf32>
    %c224 = arith.constant 224 : index
    %c0_7 = arith.constant 0 : index
    %11 = vector.load %arg5[%c224, %c0_7] : memref<232x128xf32, #tpu.memory_space<vmem>>, vector<1x128xf32>
    %cst = arith.constant dense<0.000000e+00> : vector<1x128xf32>
    %12 = tpu.matmul %7, %9, %cst {dimension_numbers = #tpu.dot_dimension_numbers<[1], [0], [0], [1], [0, 0, 1, 1], [], []>} : vector<1x32xf32>, vector<32x128xf32>, vector<1x128xf32> -> vector<1x128xf32>
    %cst_8 = arith.constant dense<0.000000e+00> : vector<1x128xf32>
    %13 = tpu.matmul %8, %10, %cst_8 {dimension_numbers = #tpu.dot_dimension_numbers<[1], [0], [0], [1], [0, 0, 1, 1], [], []>} : vector<1x32xf32>, vector<32x128xf32>, vector<1x128xf32> -> vector<1x128xf32>
    %14 = arith.addf %12, %13 : vector<1x128xf32>
    %15 = arith.addf %14, %11 : vector<1x128xf32>
    %cst_9 = arith.constant dense<0xFF800000> : vector<1xf32>
    %16 = vector.multi_reduction <maximumf>, %15, %cst_9 [1] : vector<1x128xf32> to vector<1xf32>
    %17 = vector.shape_cast %16 : vector<1xf32> to vector<1x1xf32>
    %18 = vector.broadcast %17 : vector<1x1xf32> to vector<1x128xf32>
    %19 = arith.subf %15, %18 : vector<1x128xf32>
    %20 = math.exp %19 : vector<1x128xf32>
    %cst_10 = arith.constant dense<0.000000e+00> : vector<1xf32>
    %21 = vector.multi_reduction <add>, %20, %cst_10 [1] : vector<1x128xf32> to vector<1xf32>
    %22 = vector.shape_cast %21 : vector<1xf32> to vector<1x1xf32>
    %23 = tpu.reciprocal %22 {approx = true} : vector<1x1xf32> -> vector<1x1xf32>
    %24 = vector.broadcast %23 : vector<1x1xf32> to vector<1x128xf32>
    %25 = arith.mulf %20, %24 : vector<1x128xf32>
    %c0_11 = arith.constant 0 : index
    %c0_12 = arith.constant 0 : index
    %26 = vector.load %arg3[%c0_11, %c0_12] : memref<128x32xf32, #tpu.memory_space<vmem>>, vector<128x32xf32>
    %cst_13 = arith.constant dense<0.000000e+00> : vector<1x32xf32>
    %27 = tpu.matmul %25, %26, %cst_13 {dimension_numbers = #tpu.dot_dimension_numbers<[1], [0], [0], [1], [0, 0, 1, 1], [], []>} : vector<1x128xf32>, vector<128x32xf32>, vector<1x32xf32> -> vector<1x32xf32>
    %c64 = arith.constant 64 : index
    %c0_14 = arith.constant 0 : index
    %28 = vector.load %arg5[%c64, %c0_14] : memref<232x128xf32, #tpu.memory_space<vmem>>, vector<32x32xf32>
    %c96 = arith.constant 96 : index
    %c0_15 = arith.constant 0 : index
    %29 = vector.load %arg5[%c96, %c0_15] : memref<232x128xf32, #tpu.memory_space<vmem>>, vector<32x32xf32>
    %c225 = arith.constant 225 : index
    %c0_16 = arith.constant 0 : index
    %30 = vector.load %arg5[%c225, %c0_16] : memref<232x128xf32, #tpu.memory_space<vmem>>, vector<1x32xf32>
    %cst_17 = arith.constant dense<0.000000e+00> : vector<1x32xf32>
    %31 = tpu.matmul %7, %28, %cst_17 {dimension_numbers = #tpu.dot_dimension_numbers<[1], [0], [0], [1], [0, 0, 1, 1], [], []>} : vector<1x32xf32>, vector<32x32xf32>, vector<1x32xf32> -> vector<1x32xf32>
    %cst_18 = arith.constant dense<0.000000e+00> : vector<1x32xf32>
    %32 = tpu.matmul %27, %29, %cst_18 {dimension_numbers = #tpu.dot_dimension_numbers<[1], [0], [0], [1], [0, 0, 1, 1], [], []>} : vector<1x32xf32>, vector<32x32xf32>, vector<1x32xf32> -> vector<1x32xf32>
    %33 = arith.addf %31, %32 : vector<1x32xf32>
    %34 = arith.addf %33, %30 : vector<1x32xf32>
    %cst_19 = arith.constant 0.000000e+00 : f32
    %35 = vector.broadcast %cst_19 : f32 to vector<1x32xf32>
    %36 = arith.maximumf %34, %35 : vector<1x32xf32>
    %c128 = arith.constant 128 : index
    %c0_20 = arith.constant 0 : index
    %37 = vector.load %arg5[%c128, %c0_20] : memref<232x128xf32, #tpu.memory_space<vmem>>, vector<32x96xf32>
    %c160 = arith.constant 160 : index
    %c0_21 = arith.constant 0 : index
    %38 = vector.load %arg5[%c160, %c0_21] : memref<232x128xf32, #tpu.memory_space<vmem>>, vector<32x96xf32>
    %c226 = arith.constant 226 : index
    %c0_22 = arith.constant 0 : index
    %39 = vector.load %arg5[%c226, %c0_22] : memref<232x128xf32, #tpu.memory_space<vmem>>, vector<1x96xf32>
    %c227 = arith.constant 227 : index
    %c0_23 = arith.constant 0 : index
    %40 = vector.load %arg5[%c227, %c0_23] : memref<232x128xf32, #tpu.memory_space<vmem>>, vector<1x32xf32>
    %cst_24 = arith.constant dense<0.000000e+00> : vector<1x96xf32>
    %41 = tpu.matmul %36, %37, %cst_24 {dimension_numbers = #tpu.dot_dimension_numbers<[1], [0], [0], [1], [0, 0, 1, 1], [], []>} : vector<1x32xf32>, vector<32x96xf32>, vector<1x96xf32> -> vector<1x96xf32>
    %42 = arith.addf %41, %39 : vector<1x96xf32>
    %cst_25 = arith.constant dense<0.000000e+00> : vector<1x96xf32>
    %43 = tpu.matmul %8, %38, %cst_25 {dimension_numbers = #tpu.dot_dimension_numbers<[1], [0], [0], [1], [0, 0, 1, 1], [], []>} : vector<1x32xf32>, vector<32x96xf32>, vector<1x96xf32> -> vector<1x96xf32>
    %44 = vector.extract_strided_slice %42 {offsets = [0, 0], sizes = [1, 32], strides = [1, 1]} : vector<1x96xf32> to vector<1x32xf32>
    %45 = vector.extract_strided_slice %43 {offsets = [0, 0], sizes = [1, 32], strides = [1, 1]} : vector<1x96xf32> to vector<1x32xf32>
    %46 = arith.addf %44, %45 : vector<1x32xf32>
    %47 = arith.negf %46 : vector<1x32xf32>
    %48 = math.exp %47 : vector<1x32xf32>
    %cst_26 = arith.constant 1.000000e+00 : f32
    %49 = vector.broadcast %cst_26 : f32 to vector<1x32xf32>
    %50 = arith.addf %49, %48 : vector<1x32xf32>
    %51 = arith.divf %49, %50 : vector<1x32xf32>
    %52 = vector.extract_strided_slice %42 {offsets = [0, 32], sizes = [1, 32], strides = [1, 1]} : vector<1x96xf32> to vector<1x32xf32>
    %53 = vector.extract_strided_slice %43 {offsets = [0, 32], sizes = [1, 32], strides = [1, 1]} : vector<1x96xf32> to vector<1x32xf32>
    %54 = arith.addf %52, %53 : vector<1x32xf32>
    %55 = arith.negf %54 : vector<1x32xf32>
    %56 = math.exp %55 : vector<1x32xf32>
    %cst_27 = arith.constant 1.000000e+00 : f32
    %57 = vector.broadcast %cst_27 : f32 to vector<1x32xf32>
    %58 = arith.addf %57, %56 : vector<1x32xf32>
    %59 = arith.divf %57, %58 : vector<1x32xf32>
    %60 = vector.extract_strided_slice %42 {offsets = [0, 64], sizes = [1, 32], strides = [1, 1]} : vector<1x96xf32> to vector<1x32xf32>
    %61 = vector.extract_strided_slice %43 {offsets = [0, 64], sizes = [1, 32], strides = [1, 1]} : vector<1x96xf32> to vector<1x32xf32>
    %62 = arith.addf %61, %40 : vector<1x32xf32>
    %63 = arith.mulf %51, %62 : vector<1x32xf32>
    %64 = arith.addf %60, %63 : vector<1x32xf32>
    %65 = math.tanh %64 : vector<1x32xf32>
    %cst_28 = arith.constant 1.000000e+00 : f32
    %66 = vector.broadcast %cst_28 : f32 to vector<1x32xf32>
    %67 = arith.subf %66, %59 : vector<1x32xf32>
    %68 = arith.mulf %67, %65 : vector<1x32xf32>
    %69 = arith.mulf %59, %8 : vector<1x32xf32>
    %70 = arith.addf %68, %69 : vector<1x32xf32>
    %c0_29 = arith.constant 0 : index
    %c0_30 = arith.constant 0 : index
    %71 = vector.load %arg7[%c0_29, %c0_30] : memref<1x32xf32, #tpu.memory_space<vmem>>, vector<1x32xf32>
    tpu.vector_store %arg7[%c0_29, %c0_30], %70 {strides = array<i32>} : memref<1x32xf32, #tpu.memory_space<vmem>>, vector<1x32xf32>,
    %c192 = arith.constant 192 : index
    %c0_31 = arith.constant 0 : index
    %72 = vector.load %arg5[%c192, %c0_31] : memref<232x128xf32, #tpu.memory_space<vmem>>, vector<32x128xf32>
    %c228 = arith.constant 228 : index
    %c0_32 = arith.constant 0 : index
    %73 = vector.load %arg5[%c228, %c0_32] : memref<232x128xf32, #tpu.memory_space<vmem>>, vector<1x128xf32>
    %cst_33 = arith.constant dense<0.000000e+00> : vector<1x128xf32>
    %74 = tpu.matmul %70, %72, %cst_33 {dimension_numbers = #tpu.dot_dimension_numbers<[1], [0], [0], [1], [0, 0, 1, 1], [], []>} : vector<1x32xf32>, vector<32x128xf32>, vector<1x128xf32> -> vector<1x128xf32>
    %75 = arith.addf %74, %73 : vector<1x128xf32>
    %cst_34 = arith.constant dense<0xFF800000> : vector<1xf32>
    %76 = vector.multi_reduction <maximumf>, %75, %cst_34 [1] : vector<1x128xf32> to vector<1xf32>
    %77 = vector.shape_cast %76 : vector<1xf32> to vector<1x1xf32>
    %78 = vector.broadcast %77 : vector<1x1xf32> to vector<1x128xf32>
    %79 = arith.subf %75, %78 : vector<1x128xf32>
    %80 = math.exp %79 : vector<1x128xf32>
    %cst_35 = arith.constant dense<0.000000e+00> : vector<1xf32>
    %81 = vector.multi_reduction <add>, %80, %cst_35 [1] : vector<1x128xf32> to vector<1xf32>
    %82 = vector.shape_cast %81 : vector<1xf32> to vector<1x1xf32>
    %83 = math.log %82 : vector<1x1xf32>
    %84 = arith.addf %83, %77 : vector<1x1xf32>
    %85 = vector.broadcast %84 : vector<1x1xf32> to vector<1x128xf32>
    %86 = arith.subf %75, %85 : vector<1x128xf32>
    %cst_36 = arith.constant 0.000000e+00 : f32
    %87 = vector.broadcast %cst_36 : f32 to vector<1x24xf32>
    %88 = vector.extract_strided_slice %86 {offsets = [0, 0], sizes = [1, 64], strides = [1, 1]} : vector<1x128xf32> to vector<1x64xf32>
    %89 = vector.extract_strided_slice %25 {offsets = [0, 0], sizes = [1, 8], strides = [1, 1]} : vector<1x128xf32> to vector<1x8xf32>
    %90 = tpu.concatenate %88, %70, %89, %87 in 1 : vector<1x64xf32>, vector<1x32xf32>, vector<1x8xf32>, vector<1x24xf32> -> vector<1x128xf32>
    %91 = vector.shape_cast %90 : vector<1x128xf32> to vector<1x1x128xf32>
    %c0_37 = arith.constant 0 : index
    %c0_38 = arith.constant 0 : index
    %c0_39 = arith.constant 0 : index
    %92 = vector.load %arg6[%c0_37, %c0_38, %c0_39] : memref<1x1x128xf32, #tpu.memory_space<vmem>>, vector<1x1x128xf32>
    tpu.vector_store %arg6[%c0_37, %c0_38, %c0_39], %91 {strides = array<i32>} : memref<1x1x128xf32, #tpu.memory_space<vmem>>, vector<1x1x128xf32>,
    return
  }
  func.func @transform_0(%arg0: i32, %arg1: memref<8xi32, #tpu.memory_space<smem>>) -> (i32, i32) {
    %c0_i32 = arith.constant 0 : i32
    %c0_i32_0 = arith.constant 0 : i32
    %c0_i32_1 = arith.constant 0 : i32
    return %c0_i32, %c0_i32_0 : i32, i32
  }
  func.func @transform_1(%arg0: i32, %arg1: memref<8xi32, #tpu.memory_space<smem>>) -> (i32, i32) {
    %c0_i32 = arith.constant 0 : i32
    %c0_i32_0 = arith.constant 0 : i32
    %c0_i32_1 = arith.constant 0 : i32
    return %c0_i32, %c0_i32_0 : i32, i32
  }
  func.func @transform_2(%arg0: i32, %arg1: memref<8xi32, #tpu.memory_space<smem>>) -> (i32, i32, i32) {
    %c0_i32 = arith.constant 0 : i32
    %c0_i32_0 = arith.constant 0 : i32
    %c0_i32_1 = arith.constant 0 : i32
    %c0_i32_2 = arith.constant 0 : i32
    return %c0_i32, %c0_i32_0, %c0_i32_1 : i32, i32, i32
  }
  func.func @transform_3(%arg0: i32, %arg1: memref<8xi32, #tpu.memory_space<smem>>) -> (i32, i32) {
    %c0_i32 = arith.constant 0 : i32
    %c0_i32_0 = arith.constant 0 : i32
    %c0_i32_1 = arith.constant 0 : i32
    return %c0_i32, %c0_i32_0 : i32, i32
  }
  func.func @transform_4(%arg0: i32, %arg1: memref<8xi32, #tpu.memory_space<smem>>) -> (i32, i32, i32) {
    %c0_i32 = arith.constant 0 : i32
    %c0_i32_0 = arith.constant 0 : i32
    %c0_i32_1 = arith.constant 0 : i32
    return %arg0, %c0_i32, %c0_i32_0 : i32, i32, i32
  }
}

</mosaic_0001>

<bundles_post_ra>
// kernel: attn_decoder_decode.1
= control target key start
LH: loop header
LB: loop body
LE: loop exit
PB: predicated region body
PF: predicated region fallthrough
CT: control target
= control target key end

     0   :  { %s1517_s0 = inlined_call_operand.vmem [shape: s32[8], index: 0, kind: input, shape index: {}]   ;;  %s1518_s1 = inlined_call_operand.vmem [shape: f32[1,32], index: 1, kind: input, shape index: {}]   ;;  %s1519_s2 = inlined_call_operand.vmem [shape: f32[128,32], index: 2, kind: input, shape index: {}]   ;;  %s1520_s3 = inlined_call_operand.vmem [shape: f32[64,1,32], index: 3, kind: input, shape index: {}]   ;;  %s1521_s4 = inlined_call_operand.vmem [shape: f32[232,128], index: 4, kind: input, shape index: {}]   ;;  %s1522_s5 = inlined_call_operand.vmem [shape: f32[8,1,128], index: 5, kind: output, shape index: {}]  }
   0x1   :  { %s10_s20 = sshll.u32 %s1517_s0, 4  ;;  %s11_s20 = int_to_ptr.vmem [resolvable:$true] %s10_s20 }
   0x2   :  { %s1212_s21 = scalar_lea.vmem %s11_s20, 16  ;;  %p1217_p1 = scmp.lt.s32.totalorder %s11_s20, %s11_s20 }
   0x3   :  { %p1213_p0 = scmp.ne.s32.totalorder %s11_s20, %s1212_s21  ;;  %p1218_p2 = scmp.lt.s32.totalorder %s1212_s21, %s1212_s21 }
   0x5   :  { %p1219_p3 = por %p1218_p2, %p1217_p1 }
   0x7   :  { %p1220_p4 = pnand %p1219_p3, %p1213_p0 }
   0x9   :  { %1223 = shalt.err (!%p1220_p4)  }
   0xa   :  { %s1234_s22 = smov [#allocation4]  }
   0xb   :  { %13 = dma.vmem_to_smem %s11_s20, 16, %s1234_s22, [#allocation3] }
   0xc   :  { %1228 = dma.done.wait [#allocation3], 16 }
   0xd   :  { %1229 = vsyncadd [#allocation3], 4294967280 }
   0xe   :  { %15 = sfence }
   0xf   :  { %s1274_s23 = smov 0  }
  0x10 LB: > { %s938_s0 = sadd.s32 4294967295, %s1232_s23   ;;  %p941_p5 = scmp.ge.s32.totalorder %s1232_s23, 1  ;;  %s1232_s23 = sphi %s1274_s23, %s21_s23  }
  0x11   : > { %p159_p6 = scmp.lt.s32.totalorder %s1232_s23, 9 }
  0x13   : > { %p160_p7 = pnand %p941_p5, %p159_p6 }
  0x14   : > { %p178_p8 = scmp.lt.s32.totalorder (!%p160_p7), %s938_s0, 7  ;;  %p942_p9 = scmp.ne.s32.totalorder (!%p160_p7), %s938_s0, 0 }
  0x15   : > { %163 = sbr.rel (%p160_p7) target bundleno = 2256 (0x8d0), region = 36 }
  0x1c   : > { %s1282_s24 = scalar_select %p178_p8, %s938_s0, 7 }
  0x1d   : > { %184 = sbr.rel (%p942_p9) target bundleno = 36 (0x24), region = 40  ;;  %v185_v0 = vld [vmem:[%s1518_s1] sm:$0x1] (!%p942_p9)  ;;  %vm186_vm0 = vcmask (!%p942_p9), 253952  }
  0x1e   : > { %s180_s27 = scalar_lea.vmem %s1522_s5, %s1282_s24  ;;  %187 = vst.msk [vmem:[#allocation2] sm:$0x1] (!%p942_p9), %vm186_vm0, %v185_v0 }
  0x24 PF: > { %v196_v1 = vld [vmem:[%s1521_s4 + $0x20] sm:$0xff]  ;;  %v197_v2 = vld [vmem:[%s1521_s4 + $0x28] sm:$0xff]  ;;  %v1235_v4 = vmov 0.0|0.0   ;;  %v198_v7 = vld [vmem:[%s1521_s4 + $0x30] sm:$0xff]  ;;  %s188_s17 = sld [smem:[#allocation4 + %s938_s0]]  ;;  %vm1236_vm1 = vmmov 0  }
  0x25   : > { %v192_v3 = vld [vmem:[%s1521_s4] sm:$0xff]  ;;  %1117 = vmatprep.subr.bf16.mxu0 %v1235_v4  ;;  %1123 = vmatprep.subr.bf16.mxu1 %v1235_v4  ;;  %v1118_v5 = vpack.c.bf16 %v197_v2, %v196_v1  ;;  %v193_v6 = vld [vmem:[%s1521_s4 + $0x8] sm:$0xff]  ;;  %v199_v8 = vld [vmem:[%s1521_s4 + $0x38] sm:$0xff]  ;;  %v1237_v12 = vmov 0.0   ;;  %vm201_vm2 = vcmask 261120   ;;  %vm349_vm3 = vcmask 1040384  }
  0x26   : > { %v1124_v9 = vpack.c.bf16 %v193_v6, %v192_v3  ;;  %v194_v10 = vld [vmem:[%s1521_s4 + $0x10] sm:$0xff]  ;;  %v195_v11 = vld [vmem:[%s1521_s4 + $0x18] sm:$0xff]  ;;  %1013 = vmatprep.mubr.msk.f32.mxu0 %vm1236_vm1, %v1237_v12  ;;  %1024 = vmatprep.mubr.msk.f32.mxu1 %vm1236_vm1, %v1237_v12  ;;  %v1121_v13 = vpack.c.bf16 %v199_v8, %v198_v7  ;;  %v1323_v15 = vld [vmem:[#allocation2] sm:$0x1]  ;;  %s1238_s16 = smov 64   ;;  %s1239_s14 = smov 96  }
  0x27   : > { %1119 = vmatpush3.bf16.msra.mxu0 %v1118_v5  ;;  %v1127_v14 = vpack.c.bf16 %v195_v11, %v194_v10  ;;  %v200_v20 = vld [vmem:[%s1521_s4 + $0xe0] sm:$0x1]  ;;  %v362_v26 = vld [vmem:[%s1519_s2 + $0x8] sm:$0xff]  ;;  %v363_v27 = vld [vmem:[%s1519_s2 + $0x10] sm:$0xff]  ;;  %s1240_s15 = smov 32   ;;  %vm796_vm4 = vcmask 253952  }
  0x28   : > { %1125 = vmatpush3.bf16.msra.mxu1 %v1124_v9  ;;  %1120 = vmatprep.subr.bf16.mxu0 %v1235_v4  ;;  %v361_v25 = vld [vmem:[%s1519_s2] sm:$0xff]  ;;  %v364_v29 = vld [vmem:[%s1519_s2 + $0x18] sm:$0xff]  ;;  %v366_v32 = vld [vmem:[%s1519_s2 + $0x28] sm:$0xff]  ;;  %vm895_vm5 = vcmask 523264   ;;  %vm897_vm6 = vcmask 785408   ;;  %vm899_vm7 = vcmask 850944  }
  0x29   : > { %1126 = vmatprep.subr.bf16.mxu1 %v1235_v4  ;;  %v1130_v28 = vpack.c.bf16 %v362_v26, %v361_v25  ;;  %v1133_v30 = vpack.c.bf16 %v364_v29, %v363_v27  ;;  %v365_v31 = vld [vmem:[%s1519_s2 + $0x20] sm:$0xff]  ;;  %v367_v34 = vld [vmem:[%s1519_s2 + $0x30] sm:$0xff]  ;;  %v368_v35 = vld [vmem:[%s1519_s2 + $0x38] sm:$0xff] }
  0x2a   : > { %s189_s25 = scalar_lea.vmem %s1520_s3, %s188_s17  ;;  %v1136_v33 = vpack.c.bf16 %v366_v32, %v365_v31  ;;  %v1139_v36 = vpack.c.bf16 %v368_v35, %v367_v34  ;;  %v369_v37 = vld [vmem:[%s1519_s2 + $0x40] sm:$0xff]  ;;  %v370_v38 = vld [vmem:[%s1519_s2 + $0x48] sm:$0xff]  ;;  %v371_v45 = vld [vmem:[%s1519_s2 + $0x50] sm:$0xff] }
  0x2b   : > { %1122 = vmatpush3.bf16.msra.mxu0 %v1121_v13  ;;  %v1328_v16 = vld [vmem:[%s189_s25] sm:$0x1]  ;;  %v1142_v39 = vpack.c.bf16 %v370_v38, %v369_v37  ;;  %v372_v46 = vld [vmem:[%s1519_s2 + $0x58] sm:$0xff]  ;;  %v374_v49 = vld [vmem:[%s1519_s2 + $0x68] sm:$0xff] }
  0x2c   : > { %1128 = vmatpush3.bf16.msra.mxu1 %v1127_v14  ;;  %1129 = vmatprep.subr.bf16.mxu0 %v1235_v4  ;;  %v1145_v47 = vpack.c.bf16 %v372_v46, %v371_v45  ;;  %v373_v48 = vld [vmem:[%s1519_s2 + $0x60] sm:$0xff]  ;;  %v375_v51 = vld [vmem:[%s1519_s2 + $0x70] sm:$0xff]  ;;  %v376_v52 = vld [vmem:[%s1519_s2 + $0x78] sm:$0xff] }
  0x2d   : > { %1153 = vmatprep.subr.bf16.mxu1 %v1235_v4  ;;  %v1148_v50 = vpack.c.bf16 %v374_v49, %v373_v48  ;;  %v1151_v53 = vpack.c.bf16 %v376_v52, %v375_v51  ;;  %v451_v54 = vld [vmem:[%s1521_s4 + $0x60] sm:$0xff]  ;;  %v452_v55 = vld [vmem:[%s1521_s4 + $0x68] sm:$0xff]  ;;  %v453_v56 = vld [vmem:[%s1521_s4 + $0x70] sm:$0xff] }
  0x2e   : > { %1014 = vmatmul.mubr.msk.f32.vlgmr.msra.gmra.mrb[0].mxu0 %vm201_vm2, %v1323_v15  ;;  %v1154_v57 = vpack.c.bf16 %v452_v55, %v451_v54  ;;  %v454_v58 = vld [vmem:[%s1521_s4 + $0x78] sm:$0xff]  ;;  %v447_v63 = vld [vmem:[%s1521_s4 + $0x40] sm:$0xff]  ;;  %v448_v0 = vld [vmem:[%s1521_s4 + $0x48] sm:$0xff] }
  0x2f   : > { %1025 = vmatmul.mubr.msk.f32.vlgmr.msra.gmra.mrb[0].mxu1 %vm201_vm2, %v1328_v16  ;;  %1059 = vmatprep.mubr.msk.f32.mxu0 %vm1236_vm1, %v1237_v12  ;;  %v1157_v59 = vpack.c.bf16 %v454_v58, %v453_v56  ;;  %v1160_v1 = vpack.c.bf16 %v448_v0, %v447_v63  ;;  %v449_v2 = vld [vmem:[%s1521_s4 + $0x50] sm:$0xff]  ;;  %v450_v3 = vld [vmem:[%s1521_s4 + $0x58] sm:$0xff]  ;;  %v601_v8 = vld [vmem:[%s1521_s4 + $0x80] sm:$0xff] }
  0x30   : > { %1070 = vmatprep.mubr.msk.f32.mxu1 %vm1236_vm1, %v1237_v12  ;;  %1131 = vmatpush3.bf16.msra.mxu0 %v1130_v28  ;;  %v1163_v7 = vpack.c.bf16 %v450_v3, %v449_v2  ;;  %v602_v9 = vld [vmem:[%s1521_s4 + $0x88] sm:$0xff]  ;;  %v603_v11 = vld [vmem:[%s1521_s4 + $0x90] sm:$0xff]  ;;  %v604_v13 = vld [vmem:[%s1521_s4 + $0x98] sm:$0xff] }
  0x31   : > { %1132 = vmatprep.subr.bf16.mxu0 %v1235_v4  ;;  %1155 = vmatpush3.bf16.msra.mxu1 %v1154_v57  ;;  %v1166_v10 = vpack.c.bf16 %v602_v9, %v601_v8  ;;  %v1169_v14 = vpack.c.bf16 %v604_v13, %v603_v11  ;;  %v607_v28 = vld [vmem:[%s1521_s4 + $0xb0] sm:$0xff]  ;;  %v608_v29 = vld [vmem:[%s1521_s4 + $0xb8] sm:$0xff]  ;;  %v609_v37 = vld [vmem:[%s1521_s4 + $0xe2] sm:$0x1] }
  0x32   : > { %1156 = vmatprep.subr.bf16.mxu1 %v1235_v4  ;;  %v798_v49 = vld [vmem:[%s1521_s4 + $0xc0] sm:$0xff]  ;;  %v800_v51 = vld [vmem:[%s1521_s4 + $0xd0] sm:$0xff]  ;;  %v801_v54 = vld [vmem:[%s1521_s4 + $0xd8] sm:$0xff] }
  0x33   : > { %v1181_v55 = vpack.c.bf16 %v801_v54, %v800_v51 }
  0x34   : > { %1134 = vmatpush3.bf16.msra.mxu0 %v1133_v30  ;;  %v1175_v30 = vpack.c.bf16 %v608_v29, %v607_v28 }
  0x35   : > { %1135 = vmatprep.subr.bf16.mxu0 %v1235_v4  ;;  %1158 = vmatpush3.bf16.msra.mxu1 %v1157_v59 }
  0x36   : > { %1159 = vmatprep.subr.bf16.mxu1 %v1235_v4 }
  0x38   : > { %1137 = vmatpush3.bf16.msra.mxu0 %v1136_v33 }
  0x39   : > { %1138 = vmatprep.subr.bf16.mxu0 %v1235_v4 }
  0x3c   : > { %1140 = vmatpush3.bf16.msra.mxu0 %v1139_v36 }
  0x3d   : > { %1141 = vmatprep.subr.bf16.mxu0 %v1235_v4 }
  0x40   : > { %1143 = vmatpush3.bf16.msra.mxu0 %v1142_v39 }
  0x41   : > { %1144 = vmatprep.subr.bf16.mxu0 %v1235_v4 }
  0x44   : > { %1146 = vmatpush3.bf16.msra.mxu0 %v1145_v47  ;;  %v783_v47 = vlaneseq }
  0x45   : > { %1147 = vmatprep.subr.bf16.mxu0 %v1235_v4 }
  0x46   : > { %v784_v48 = vshrl.u32 %v783_v47, 7 }
  0x48   : > { %1149 = vmatpush3.bf16.msra.mxu0 %v1148_v50  ;;  %v799_v50 = vld [vmem:[%s1521_s4 + $0xc8] sm:$0xff]  ;;  %v785_v52 = vsub.s32 0, %v784_v48 }
  0x49   : > { %1150 = vmatprep.subr.bf16.mxu0 %v1235_v4 }
  0x4a   : > { %v786_v57 = vrot.slane %v1323_v15, %v785_v52 }
  0x4c   : > { %1152 = vmatpush3.bf16.msra.mxu0 %v1151_v53  ;;  %v1178_v53 = vpack.c.bf16 %v799_v50, %v798_v49 }
  0x4d   : > { %1177 = vmatprep.subr.bf16.mxu0 %v1235_v4 }
 0x101   : > { %v271_v17 = vpop.f32.mrb[0].mxu0 }
 0x102   : > { %v344_v18 = vpop.f32.mrb[0].mxu1  ;;  %v1015_v19 = vpop.f32.mrb[1].mxu0 }
 0x103   : > { %v345_v21 = vadd.f32 %v344_v18, %v271_v17  ;;  %v1026_v22 = vpop.f32.mrb[1].mxu1  ;;  %v455_v19 = vld [vmem:[%s1521_s4 + $0xe1] sm:$0x1] }
 0x105   : > { %v348_v23 = vadd.f32 %v345_v21, %v200_v20 }
 0x107   : > { %v350_v24 = vsel %vm349_vm3, %v348_v23, -inf }
 0x108   : > { %351 = vmax.xlane.f32.xlu0 %v350_v24  ;;  %v606_v24 = vld [vmem:[%s1521_s4 + $0xa8] sm:$0xff] }
 0x195   : > { %v352_v40 = vpop.xlane.xlu0 %351 }
 0x196   : > { %v353_v41 = vsub.f32 %v348_v23, %v352_v40  ;;  %v605_v23 = vld [vmem:[%s1521_s4 + $0xa0] sm:$0xff] }
 0x197   : > { %v1172_v26 = vpack.c.bf16 %v606_v24, %v605_v23 }
 0x198   : > { %v354_v42 = vmul.f32 1.442695, %v353_v41 }
 0x19a   : > { %1198 = vpow2.f32 %v354_v42 }
 0x1a4   : > { %v1199_v43 = vpop.eup %1198 }
 0x1a5   : > { %v356_v44 = vsel %vm349_vm3, %v1199_v43, 0.0 }
 0x1a6   : > { %357 = vadd.xlane.f32.xlu0 %v356_v44 }
 0x233   : > { %v358_v60 = vpop.xlane.xlu0 %357 }
 0x234   : > { %1200 = vrcp.f32 %v358_v60 }
 0x23e   : > { %v1201_v61 = vpop.eup %1200 }
 0x23f   : > { %v1415_v62 = vmul.f32 %v1201_v61, %v1199_v43 }
 0x241   : > { %1060 = vmatmul.mubr.f32.vlgmr.msra.gmra.mrb[2].mxu0 %v1415_v62 }
 0x242   : > { %1114 = vmatprep.mubr.msk.f32.mxu0 %vm1236_vm1, %v1237_v12  ;;  %1179 = vmatpush3.bf16.msra.mxu0 %v1178_v53 }
 0x243   : > { %1180 = vmatprep.subr.bf16.mxu0 %v1235_v4 }
 0x246   : > { %1182 = vmatpush3.bf16.msra.mxu0 %v1181_v55 }
 0x314   : > { %v443_v5 = vpop.f32.mrb[2].mxu0 }
 0x315   : > { %v1061_v6 = vpop.f32.mrb[3].mxu0  ;;  %1071 = vmatmul.mubr.msk.f32.vlgmr.msra.gmra.mrb[2].mxu1 %vm201_vm2, %v443_v5 }
 0x316   : > { %1161 = vmatpush3.bf16.msra.mxu1 %v1160_v1  ;;  %1081 = vmatprep.mubr.msk.f32.mxu1 %vm1236_vm1, %v1237_v12 }
 0x317   : > { %1162 = vmatprep.subr.bf16.mxu1 %v1235_v4 }
 0x31a   : > { %1164 = vmatpush3.bf16.msra.mxu1 %v1163_v7 }
 0x31b   : > { %1165 = vmatprep.subr.bf16.mxu1 %v1235_v4 }
 0x31d   : > { %1082 = vmatmul.mubr.msk.f32.vlgmr.msra.gmra.mrb[4].mxu1 %vm201_vm2, %v1328_v16  ;;  %v610_v16 = vld [vmem:[%s1521_s4 + $0xe3] sm:$0x1] }
 0x31e   : > { %1092 = vmatprep.mubr.msk.f32.mxu1 %vm1236_vm1, %v1237_v12  ;;  %1167 = vmatpush3.bf16.msra.mxu1 %v1166_v10 }
 0x31f   : > { %1168 = vmatprep.subr.bf16.mxu1 %v1235_v4  ;;  %762 = vrot.lane.b32.xlu1 %v610_v16, %s1238_s16 }
 0x322   : > { %1170 = vmatpush3.bf16.msra.mxu1 %v1169_v14 }
 0x323   : > { %1171 = vmatprep.subr.bf16.mxu1 %v1235_v4 }
 0x391   : > { %v763_v33 = vpop.permute.xlu1 %762 }
 0x3e8   : > { %v525_v17 = vpop.f32.mrb[2].mxu1 }
 0x3e9   : > { %v1072_v18 = vpop.f32.mrb[3].mxu1 }
 0x3f0   : > { %v595_v20 = vpop.f32.mrb[4].mxu1 }
 0x3f1   : > { %v596_v21 = vadd.f32 %v595_v20, %v525_v17  ;;  %v1083_v22 = vpop.f32.mrb[5].mxu1 }
 0x3f3   : > { %v599_v25 = vadd.f32 %v596_v21, %v455_v19 }
 0x3f5   : > { %v600_v27 = vmax.f32 %v599_v25, 0.0 }
 0x3f7   : > { %1093 = vmatmul.mubr.msk.f32.vlgmr.msra.gmra.mrb[6].mxu1 %vm201_vm2, %v600_v27 }
 0x3f8   : > { %1173 = vmatpush3.bf16.msra.mxu1 %v1172_v26  ;;  %1103 = vmatprep.mubr.msk.f32.mxu1 %vm1236_vm1, %v1237_v12 }
 0x3f9   : > { %1174 = vmatprep.subr.bf16.mxu1 %v1235_v4  ;;  %v802_v4 = vld [vmem:[%s1521_s4 + $0xe4] sm:$0x1] }
 0x3fc   : > { %1176 = vmatpush3.bf16.msra.mxu1 %v1175_v30 }
 0x3ff   : > { %1104 = vmatmul.mubr.msk.f32.vlgmr.msra.gmra.mrb[8].mxu1 %vm201_vm2, %v1323_v15 }
 0x4ca   : > { %v680_v31 = vpop.f32.mrb[6].mxu1 }
 0x4cb   : > { %v1094_v32 = vpop.f32.mrb[7].mxu1  ;;  %v681_v38 = vadd.f32 %v680_v31, %v609_v37 }
 0x4d2   : > { %v750_v34 = vpop.f32.mrb[8].mxu1 }
 0x4d3   : > { %v765_v35 = vadd.f32 %v763_v33, %v750_v34  ;;  %v1105_v36 = vpop.f32.mrb[9].mxu1  ;;  %v754_v12 = vadd.f32 %v750_v34, %v681_v38 }
 0x4d5   : > { %767 = vrot.lane.b32.xlu1 %v765_v35, %s1238_s16  ;;  %v949_v39 = vmul.f32 -1.442695, %v754_v12 }
 0x4d7   : > { %1202 = vpow2.f32 %v949_v39 }
 0x4e1   : > { %v1203_v40 = vpop.eup %1202 }
 0x4e2   : > { %v758_v41 = vadd.f32 1.0, %v1203_v40 }
 0x4e4   : > { %1204 = vrcp.f32 %v758_v41 }
 0x4ee   : > { %v1205_v42 = vpop.eup %1204 }
 0x4ef   : > { %v777_v59 = vsub.f32 1.0, %v1205_v42 }
 0x547   : > { %v768_v43 = vpop.permute.xlu1 %767 }
 0x548   : > { %v770_v44 = vmul.f32 %v1205_v42, %v768_v43 }
 0x54a   : > { %772 = vrot.lane.b32.xlu0 %v770_v44, %s1238_s16 }
 0x5bc   : > { %v773_v45 = vpop.permute.xlu0 %772 }
 0x5bd   : > { %v775_v46 = vadd.f32 %v773_v45, %v681_v38 }
 0x5bf   : > { %1206 = vtanh.f32 %v775_v46 }
 0x5c9   : > { %v1207_v56 = vpop.eup %1206 }
 0x5ca   : > { %779 = vrot.lane.b32.xlu1 %v1207_v56, %s1239_s14 }
 0x5ce   : > { %787 = vrot.lane.b32.xlu1 %v786_v57, %s1240_s15 }
 0x63c   : > { %v780_v58 = vpop.permute.xlu1 %779 }
 0x63d   : > { %v782_v61 = vmul.f32 %v780_v58, %v777_v59 }
 0x640   : > { %v788_v60 = vpop.permute.xlu1 %787 }
 0x641   : > { %v790_v63 = vmul.f32 %v1205_v42, %v788_v60 }
 0x643   : > { %v791_v0 = vadd.f32 %v790_v63, %v782_v61 }
 0x645   : > { %793 = vrot.lane.b32.xlu1 %v791_v0, %s1239_s14 }
 0x6b7   : > { %v794_v1 = vpop.permute.xlu1 %793 }
 0x6b8   : > { %797 = vst.msk [vmem:[#allocation2] sm:$0x1] %vm796_vm4, %v794_v1  ;;  %1115 = vmatmul.mubr.msk.f32.vlgmr.msra.gmra.mrb[4].mxu0 %vm201_vm2, %v794_v1 }
 0x78b   : > { %v871_v15 = vpop.f32.mrb[4].mxu0 }
 0x78c   : > { %v872_v2 = vadd.f32 %v871_v15, %v802_v4  ;;  %v1116_v3 = vpop.f32.mrb[5].mxu0 }
 0x78e   : > { %v875_v5 = vsel %vm349_vm3, %v872_v2, -inf }
 0x78f   : > { %876 = vmax.xlane.f32.xlu1 %v875_v5 }
 0x7a0   : > { %888 = vrot.lane.b32.xlu1 %v791_v0, %s1240_s15 }
 0x81c   : > { %v877_v6 = vpop.xlane.xlu1 %876 }
 0x81d   : > { %v878_v7 = vsub.f32 %v872_v2, %v877_v6 }
 0x81f   : > { %v879_v8 = vmul.f32 1.442695, %v878_v7 }
 0x820   : > { %v889_v18 = vpop.permute.xlu1 %888 }
 0x821   : > { %1208 = vpow2.f32 %v879_v8 }
 0x82b   : > { %v1209_v9 = vpop.eup %1208 }
 0x82c   : > { %v881_v10 = vsel %vm349_vm3, %v1209_v9, 0.0 }
 0x82d   : > { %882 = vadd.xlane.f32.xlu0 %v881_v10 }
 0x843   : > { %892 = vrot.lane.b32.xlu0 %v1415_v62, %s1239_s14 }
 0x8ba   : > { %v883_v11 = vpop.xlane.xlu0 %882 }
 0x8bb   : > { %1210 = vlog2.f32 %v883_v11 }
 0x8be   : > { %v893_v19 = vpop.permute.xlu0 %892 }
 0x8c5   : > { %v1211_v13 = vpop.eup %1210 }
 0x8c6   : > { %v885_v14 = vmul.f32 0.6931472, %v1211_v13 }
 0x8c8   : > { %v886_v16 = vadd.f32 %v885_v14, %v877_v6 }
 0x8ca   : > { %v887_v17 = vsub.f32 %v872_v2, %v886_v16 }
 0x8cc   : > { %v896_v20 = vsel %vm895_vm5, %v887_v17, %v889_v18 }
 0x8cd   : > { %v898_v21 = vsel %vm897_vm6, %v896_v20, %v893_v19 }
 0x8ce   : > { %v900_v22 = vsel %vm899_vm7, %v898_v21, 0.0 }
 0x8cf   : > { %901 = vst [vmem:[%s180_s27] sm:$0x1] %v900_v22 }
 0x8d0 PF: > { %s21_s23 = sadd.s32 1, %s1232_s23  }
 0x8d1   : > { %p18_p10 = scmp.ge.s32.totalorder %s21_s23, 10  }
 0x8d3   :  { %20 = sbr.rel (!%p18_p10) target bundleno = 16 (0x10), region = 68 }

</bundles_post_ra>
